<compile_context>
chip_gen: v5e
topology: v5e:2x2
jax: 0.10.0
libtpu: 0.0.40
codegen_flags: <defaults>
</compile_context>

<pallas_src>
import functools

import jax
import jax.numpy as jnp
from jax.experimental import pallas as pl
from jax.experimental.pallas import tpu as pltpu

_LANES = 128      # batch elements per output row (lane width of the output tile)
_SUBLANES = 8     # sublane granularity


def affine_kernel(b_ref, m_ref, x_ref, o_ref):
    """o = X @ M + b.

    X tile : (TR, 2*L) f32 — 128 batch elements per row, features interleaved.
    M      : (2*L, L)  f32 — de-interleave + scale matrix, resident in VMEM.
    o tile : (TR, L)   f32 — lane- and sublane-dense result.
    """
    o_ref[...] = (
        jnp.dot(
            x_ref[...],
            m_ref[...],
            preferred_element_type=jnp.float32,
            precision=jax.lax.Precision.HIGHEST,   # exact f32 (only 2 nonzeros/column)
        )
        + b_ref[0]
    )


def _fold_affine_chain(params):
    """Compose the activation-free chain of affine layers into one affine map (exact)."""
    w_eff, b_eff = params[0]                       # [2, 8], [1, 8]
    for w_t, b in params[1:]:
        w_eff = w_eff @ w_t                        # -> [2, out]
        b_eff = b_eff @ w_t + b                    # -> [1, out]
    return w_eff, b_eff                            # [2, 1], [1, 1]


@functools.partial(jax.jit, static_argnames=("rows_per_block",))
def circle_model_nobas(x, params, *, rows_per_block=2048):
    """x: [batch, 2] float32.  params: list of (W_t [in, out], b [1, out])."""
    assert x.ndim == 2 and x.shape[1] == 2
    assert rows_per_block % _SUBLANES == 0
    batch = x.shape[0]
    L = _LANES

    # Fold 6 layers -> 1 affine map.
    w_eff, b_eff = _fold_affine_chain(params)      # [2, 1], [1, 1]
    w0, w1 = w_eff[0, 0], w_eff[1, 0]

    # De-interleave + scale matrix: (X @ M)[r, j] = w0*x0 + w1*x1 of batch elem r*L+j.
    k = jnp.arange(2 * L)[:, None]
    j = jnp.arange(L)[None, :]
    m = jnp.where(k == 2 * j, w0,
                  jnp.where(k == 2 * j + 1, w1, 0.0)).astype(jnp.float32)   # [256, 128]

    # Lane+sublane-dense view of x via free reshapes (zero-copy when aligned).
    pad_unit = _SUBLANES * L                       # 1024 batch elements
    padded = pl.cdiv(batch, pad_unit) * pad_unit
    x_flat = x.astype(jnp.float32).reshape(-1)     # [2*batch], contiguous
    if padded != batch:
        x_flat = jnp.pad(x_flat, (0, 2 * (padded - batch)))
    rows = padded // L
    x2d = x_flat.reshape(rows, 2 * L)              # free reshape, no transpose

    tr = min(rows_per_block, rows)                 # rows is a multiple of 8
    grid = (pl.cdiv(rows, tr),)                    # partial last block handled by Pallas

    out2d = pl.pallas_call(
        affine_kernel,
        out_shape=jax.ShapeDtypeStruct((rows, L), jnp.float32),
        grid=grid,
        in_specs=[
            pl.BlockSpec(memory_space=pltpu.MemorySpace.SMEM),   # folded bias, (1,)
            pl.BlockSpec((2 * L, L), lambda i: (0, 0)),          # M, resident in VMEM
            pl.BlockSpec((tr, 2 * L), lambda i: (i, 0)),         # x slab
            # (pl.Buffered(3) on the x spec is a further few-% option at large tiles.)
        ],
        out_specs=pl.BlockSpec((tr, L), lambda i: (i, 0)),       # lane-dense output
        compiler_params=pltpu.CompilerParams(
            dimension_semantics=("parallel",)),
    )(b_eff.reshape(1).astype(jnp.float32), m, x2d)

    # Free reshape; the slice is the identity when batch is aligned.
    return out2d.reshape(-1)[:batch].reshape(batch, 1)


def init_params(key):
    """Deterministic parameter init matching the nn.Linear shapes."""
    dims = [(2, 8), (8, 8), (8, 8), (8, 8), (8, 8), (8, 1)]
    params = []
    for fan_in, fan_out in dims:
        key, kw, kb = jax.random.split(key, 3)
        bound = 1.0 / jnp.sqrt(fan_in)
        # PyTorch stores W as [out, in]; we build it transposed [in, out] directly.
        w_t = jax.random.uniform(kw, (fan_in, fan_out), jnp.float32, -bound, bound)
        b = jax.random.uniform(kb, (1, fan_out), jnp.float32, -bound, bound)
        params.append((w_t, b))
    return params


def reference(x, params):
    h = x
    for w_t, b in params:
        h = h @ w_t + b
    return h


if __name__ == "__main__":
    key = jax.random.PRNGKey(0)
    key, kx1, kx2 = jax.random.split(key, 3)
    params = init_params(key)

    # Small, unaligned batch: exercises flat-tail padding + a single-step grid.
    x_small = jax.random.normal(kx1, (300, 2), jnp.float32)
    out_small = jax.block_until_ready(circle_model_nobas(x_small, params))
    ref_small = reference(x_small, params)
    assert out_small.shape == (300, 1)
    assert jnp.allclose(out_small, ref_small, atol=5e-5, rtol=1e-4), \
        float(jnp.max(jnp.abs(out_small - ref_small)))

    # Aligned batch with a forced multi-step grid: exercises the zero-copy reshape
    # path, pipelined x/out DMAs and the resident M block across grid steps.
    x_big = jax.random.normal(kx2, (4096, 2), jnp.float32)
    out_big = jax.block_until_ready(
        circle_model_nobas(x_big, params, rows_per_block=16))
    ref_big = reference(x_big, params)
    assert out_big.shape == (4096, 1)
    assert jnp.allclose(out_big, ref_big, atol=5e-5, rtol=1e-4), \
        float(jnp.max(jnp.abs(out_big - ref_big)))

    print("KERNEL_OK")
</pallas_src>

<mosaic_0001>
module attributes {stable_mosaic.version = 11 : i64} {
  func.func @affine_kernel(%arg0: i32, %arg1: memref<1xf32, #tpu.memory_space<smem>>, %arg2: memref<256x128xf32, #tpu.memory_space<vmem>>, %arg3: memref<8x256xf32, #tpu.memory_space<vmem>>, %arg4: memref<8x128xf32, #tpu.memory_space<vmem>>) attributes {dimension_semantics = [#tpu.dimension_semantics<parallel>], iteration_bounds = array<i64: 1>, scalar_prefetch = 0 : i64, scratch_operands = 0 : i64, tpu.core_type = #tpu.core_type<tc>, window_params = [{transform_indices = @transform_0, window_bounds = array<i64: 1>}, {pipeline_mode = #tpu.pipeline_mode<synchronous>, transform_indices = @transform_1, window_bounds = array<i64: 256, 128>}, {transform_indices = @transform_2, window_bounds = array<i64: 8, 256>}, {transform_indices = @transform_3, window_bounds = array<i64: 8, 128>}]} {
    %c0 = arith.constant 0 : index
    %c0_0 = arith.constant 0 : index
    %0 = vector.load %arg3[%c0, %c0_0] : memref<8x256xf32, #tpu.memory_space<vmem>>, vector<8x256xf32>
    %c0_1 = arith.constant 0 : index
    %c0_2 = arith.constant 0 : index
    %1 = vector.load %arg2[%c0_1, %c0_2] : memref<256x128xf32, #tpu.memory_space<vmem>>, vector<256x128xf32>
    %cst = arith.constant dense<0.000000e+00> : vector<8x128xf32>
    %2 = tpu.matmul %0, %1, %cst {dimension_numbers = #tpu.dot_dimension_numbers<[1], [0], [0], [1], [0, 0, 1, 1], [], []>, precision = #tpu.contract_precision<fp32>} : vector<8x256xf32>, vector<256x128xf32>, vector<8x128xf32> -> vector<8x128xf32>
    %c0_3 = arith.constant 0 : index
    %3 = memref.load %arg1[%c0_3] : memref<1xf32, #tpu.memory_space<smem>>
    %4 = vector.broadcast %3 : f32 to vector<8x128xf32>
    %5 = arith.addf %2, %4 : vector<8x128xf32>
    %c0_4 = arith.constant 0 : index
    %c0_5 = arith.constant 0 : index
    %6 = vector.load %arg4[%c0_4, %c0_5] : memref<8x128xf32, #tpu.memory_space<vmem>>, vector<8x128xf32>
    tpu.vector_store %arg4[%c0_4, %c0_5], %5 {strides = array<i32>} : memref<8x128xf32, #tpu.memory_space<vmem>>, vector<8x128xf32>,
    return
  }
  func.func @transform_0(%arg0: i32) -> i32 {
    %c0_i32 = arith.constant 0 : i32
    %c0_i32_0 = arith.constant 0 : i32
    return %c0_i32 : i32
  }
  func.func @transform_1(%arg0: i32) -> (i32, i32) {
    %c0_i32 = arith.constant 0 : i32
    %c0_i32_0 = arith.constant 0 : i32
    %c0_i32_1 = arith.constant 0 : i32
    return %c0_i32, %c0_i32_0 : i32, i32
  }
  func.func @transform_2(%arg0: i32) -> (i32, i32) {
    %c0_i32 = arith.constant 0 : i32
    %c0_i32_0 = arith.constant 0 : i32
    return %arg0, %c0_i32 : i32, i32
  }
  func.func @transform_3(%arg0: i32) -> (i32, i32) {
    %c0_i32 = arith.constant 0 : i32
    %c0_i32_0 = arith.constant 0 : i32
    return %arg0, %c0_i32 : i32, i32
  }
}

</mosaic_0001>

<bundles_post_ra>
// kernel: circle_model_nobas.1
= control target key start
LH: loop header
LB: loop body
LE: loop exit
PB: predicated region body
PF: predicated region fallthrough
CT: control target
= control target key end

     0   :  { %s1372_s1 = inlined_call_operand.vmem [shape: f32[256,128], index: 1, kind: input, shape index: {}]   ;;  %s1373_s2 = inlined_call_operand.vmem [shape: f32[8,256], index: 2, kind: input, shape index: {}]   ;;  %s1374_s0 = inlined_call_operand.<no memory space> [shape: f32[1], index: 0, kind: input, shape index: {}]   ;;  %s1375_s3 = inlined_call_operand.vmem [shape: f32[8,128], index: 3, kind: output, shape index: {}]  }
   0x1   :  { %v32_v0 = vld [vmem:[%s1372_s1 + $0x78] sm:$0xff]  ;;  %v31_v1 = vld [vmem:[%s1372_s1 + $0x70] sm:$0xff]  ;;  %v30_v2 = vld [vmem:[%s1372_s1 + $0x68] sm:$0xff] }
   0x2   :  { %v767_v3 = vand.u32 4294901760, %v32_v0  ;;  %v769_v4 = vand.u32 4294901760, %v31_v1  ;;  %v771_v5 = vand.u32 4294901760, %v30_v2  ;;  %v29_v6 = vld [vmem:[%s1372_s1 + $0x60] sm:$0xff]  ;;  %v28_v7 = vld [vmem:[%s1372_s1 + $0x58] sm:$0xff]  ;;  %v27_v8 = vld [vmem:[%s1372_s1 + $0x50] sm:$0xff] }
   0x3   :  { %v782_v9 = vand.u32 4294901760, %v29_v6  ;;  %v784_v10 = vand.u32 4294901760, %v28_v7  ;;  %v786_v11 = vand.u32 4294901760, %v27_v8  ;;  %v26_v12 = vld [vmem:[%s1372_s1 + $0x48] sm:$0xff]  ;;  %v25_v13 = vld [vmem:[%s1372_s1 + $0x40] sm:$0xff]  ;;  %v24_v21 = vld [vmem:[%s1372_s1 + $0x38] sm:$0xff] }
   0x4   :  { %52 = vmatpush.msra.mxu0 %v767_v3  ;;  %v796_v14 = vsub.f32 %v32_v0, %v767_v3  ;;  %v799_v15 = vsub.f32 %v31_v1, %v769_v4  ;;  %248 = vmatpush.msra.mxu3 %v767_v3  ;;  %v803_v16 = vsub.f32 %v30_v2, %v771_v5  ;;  %v805_v17 = vand.u32 4294901760, %v26_v12  ;;  %v23_v26 = vld [vmem:[%s1372_s1 + $0x30] sm:$0xff]  ;;  %v22_v36 = vld [vmem:[%s1372_s1 + $0x28] sm:$0xff]  ;;  %v21_v42 = vld [vmem:[%s1372_s1 + $0x20] sm:$0xff] }
   0x5   :  { %v808_v18 = vsub.f32 %v29_v6, %v782_v9  ;;  %v811_v19 = vsub.f32 %v28_v7, %v784_v10  ;;  %v814_v20 = vsub.f32 %v27_v8, %v786_v11  ;;  %v824_v25 = vand.u32 4294901760, %v25_v13  ;;  %v20_v47 = vld [vmem:[%s1372_s1 + $0x18] sm:$0xff]  ;;  %v19_v54 = vld [vmem:[%s1372_s1 + $0x10] sm:$0xff]  ;;  %v18_v61 = vld [vmem:[%s1372_s1 + $0x8] sm:$0xff] }
   0x6   :  { %54 = vmatpush.msra.mxu0 %v769_v4  ;;  %195 = vmatpush.msra.mxu2 %v796_v14  ;;  %v94_v22 = vand.u32 4294901760, %v796_v14  ;;  %v1391_v23 = vand.u32 4294901760, %v799_v15  ;;  %v1389_v24 = vand.u32 4294901760, %v803_v16  ;;  %v833_v29 = vsub.f32 %v26_v12, %v805_v17  ;;  %v48_v59 = vld [vmem:[%s1372_s1 + $0xf8] sm:$0xff]  ;;  %v17_v2 = vld [vmem:[%s1372_s1] sm:$0xff]  ;;  %v47_v6 = vld [vmem:[%s1372_s1 + $0xf0] sm:$0xff] }
   0x7   :  { %250 = vmatpush.msra.mxu3 %v769_v4  ;;  %v1388_v27 = vand.u32 4294901760, %v808_v18  ;;  %v1385_v28 = vand.u32 4294901760, %v811_v19  ;;  %v846_v33 = vand.u32 4294901760, %v24_v21  ;;  %v849_v34 = vand.u32 4294901760, %v23_v26 }
   0x8   :  { %56 = vmatpush.msra.mxu0 %v771_v5  ;;  %198 = vmatpush.msra.mxu2 %v799_v15  ;;  %v95_v30 = vsub.f32 %v796_v14, %v94_v22  ;;  %v101_v31 = vsub.f32 %v799_v15, %v1391_v23  ;;  %v107_v32 = vsub.f32 %v803_v16, %v1389_v24  ;;  %v1383_v35 = vand.u32 4294901760, %v814_v20 }
   0x9   :  { %252 = vmatpush.msra.mxu3 %v771_v5  ;;  %v113_v39 = vsub.f32 %v808_v18, %v1388_v27  ;;  %v861_v40 = vsub.f32 %v25_v13, %v824_v25  ;;  %v119_v41 = vsub.f32 %v811_v19, %v1385_v28  ;;  %v871_v44 = vand.u32 4294901760, %v22_v36 }
   0xa   :  { %58 = vmatpush.msra.mxu0 %v782_v9  ;;  %v96_v37 = vand.u32 4294901760, %v95_v30  ;;  %201 = vmatpush.msra.mxu2 %v803_v16  ;;  %v102_v38 = vand.u32 4294901760, %v101_v31  ;;  %v108_v43 = vand.u32 4294901760, %v107_v32  ;;  %v1382_v45 = vand.u32 4294901760, %v833_v29  ;;  %v46_v32 = vld [vmem:[%s1372_s1 + $0xe8] sm:$0xff] }
   0xb   :  { %254 = vmatpush.msra.mxu3 %v782_v9  ;;  %v875_v46 = vsub.f32 %v24_v21, %v846_v33  ;;  %v125_v48 = vsub.f32 %v814_v20, %v1383_v35  ;;  %v114_v49 = vand.u32 4294901760, %v113_v39  ;;  %v886_v50 = vand.u32 4294901760, %v21_v42 }
   0xc   :  { %60 = vmatpush.msra.mxu0 %v784_v10  ;;  %97 = vmatpush.msra.mxu1 %v96_v37  ;;  %v1381_v51 = vand.u32 4294901760, %v861_v40  ;;  %v890_v52 = vsub.f32 %v23_v26, %v849_v34  ;;  %v894_v53 = vand.u32 4294901760, %v20_v47  ;;  %v120_v55 = vand.u32 4294901760, %v119_v41 }
   0xd   :  { %204 = vmatpush.msra.mxu2 %v808_v18  ;;  %256 = vmatpush.msra.mxu3 %v784_v10  ;;  %v131_v56 = vsub.f32 %v833_v29, %v1382_v45  ;;  %v1380_v57 = vand.u32 4294901760, %v875_v46  ;;  %v905_v58 = vsub.f32 %v22_v36, %v871_v44  ;;  %v126_v60 = vand.u32 4294901760, %v125_v48  ;;  %v41_v45 = vld [vmem:[%s1372_s1 + $0xc0] sm:$0xff] }
   0xe   :  { %62 = vmatpush.msra.mxu0 %v786_v11  ;;  %103 = vmatpush.msra.mxu1 %v102_v38  ;;  %v137_v62 = vsub.f32 %v861_v40, %v1381_v51  ;;  %v919_v63 = vand.u32 4294901760, %v19_v54  ;;  %v1379_v0 = vand.u32 4294901760, %v890_v52  ;;  %v923_v1 = vsub.f32 %v21_v42, %v886_v50 }
   0xf   :  { %207 = vmatpush.msra.mxu2 %v811_v19  ;;  %258 = vmatpush.msra.mxu3 %v786_v11  ;;  %v934_v7 = vsub.f32 %v20_v47, %v894_v53  ;;  %v936_v8 = vand.u32 4294901760, %v48_v59  ;;  %v132_v12 = vand.u32 4294901760, %v131_v56  ;;  %v143_v13 = vsub.f32 %v875_v46, %v1380_v57 }
  0x10   :  { %64 = vmatpush.msra.mxu0 %v805_v17  ;;  %109 = vmatpush.msra.mxu1 %v108_v43  ;;  %v942_v21 = vand.u32 4294901760, %v18_v61  ;;  %v1377_v26 = vand.u32 4294901760, %v905_v58  ;;  %v947_v30 = vand.u32 4294901760, %v17_v2  ;;  %v949_v31 = vand.u32 4294901760, %v47_v6  ;;  %v45_v43 = vld [vmem:[%s1372_s1 + $0xe0] sm:$0xff] }
  0x11   :  { %210 = vmatpush.msra.mxu2 %v814_v20  ;;  %260 = vmatpush.msra.mxu3 %v805_v17  ;;  %v138_v36 = vand.u32 4294901760, %v137_v62  ;;  %v149_v37 = vsub.f32 %v890_v52, %v1379_v0  ;;  %v1376_v38 = vand.u32 4294901760, %v923_v1  ;;  %v960_v39 = vsub.f32 %v19_v54, %v919_v63 }
  0x12   :  { %66 = vmatpush.msra.mxu0 %v824_v25  ;;  %115 = vmatpush.msra.mxu1 %v114_v49  ;;  %v1378_v41 = vand.u32 4294901760, %v934_v7  ;;  %v966_v42 = vsub.f32 %v48_v59, %v936_v8  ;;  %v144_v47 = vand.u32 4294901760, %v143_v13  ;;  %v155_v48 = vsub.f32 %v905_v58, %v1377_v26  ;;  %v44_v59 = vld [vmem:[%s1372_s1 + $0xd8] sm:$0xff]  ;;  %v43_v13 = vld [vmem:[%s1372_s1 + $0xd0] sm:$0xff] }
  0x13   :  { %213 = vmatpush.msra.mxu2 %v833_v29  ;;  %262 = vmatpush.msra.mxu3 %v824_v25  ;;  %v976_v49 = vsub.f32 %v18_v61, %v942_v21  ;;  %v978_v54 = vand.u32 4294901760, %v46_v32  ;;  %v986_v56 = vsub.f32 %v47_v6, %v949_v31  ;;  %v161_v61 = vsub.f32 %v923_v1, %v1376_v38 }
  0x14   :  { %68 = vmatpush.msra.mxu0 %v846_v33  ;;  %121 = vmatpush.msra.mxu1 %v120_v55  ;;  %v983_v55 = vsub.f32 %v17_v2, %v947_v30  ;;  %v1384_v62 = vand.u32 4294901760, %v960_v39  ;;  %v167_v2 = vsub.f32 %v934_v7, %v1378_v41  ;;  %v1386_v6 = vand.u32 4294901760, %v966_v42 }
  0x15   :  { %216 = vmatpush.msra.mxu2 %v861_v40  ;;  %264 = vmatpush.msra.mxu3 %v846_v33  ;;  %v1010_v38 = vsub.f32 %v46_v32, %v978_v54  ;;  %v1012_v26 = vand.u32 4294901760, %v44_v59  ;;  %v1390_v0 = vand.u32 4294901760, %v986_v56  ;;  %v1028_v51 = vand.u32 4294901760, %v43_v13 }
  0x16   :  { %70 = vmatpush.msra.mxu0 %v849_v34  ;;  %127 = vmatpush.msra.mxu1 %v126_v60  ;;  %v150_v60 = vand.u32 4294901760, %v149_v37  ;;  %v1387_v37 = vand.u32 4294901760, %v976_v49  ;;  %v1392_v41 = vand.u32 4294901760, %v983_v55  ;;  %v173_v32 = vsub.f32 %v960_v39, %v1384_v62 }
  0x17   :  { %219 = vmatpush.msra.mxu2 %v875_v46  ;;  %266 = vmatpush.msra.mxu3 %v849_v34  ;;  %v168_v35 = vand.u32 4294901760, %v167_v2  ;;  %v1044_v62 = vsub.f32 %v44_v59, %v1012_v26  ;;  %v40_v2 = vld [vmem:[%s1372_s1 + $0xb8] sm:$0xff]  ;;  %v1064_v24 = vsub.f32 %v43_v13, %v1028_v51 }
  0x18   :  { %72 = vmatpush.msra.mxu0 %v871_v44  ;;  %133 = vmatpush.msra.mxu1 %v132_v12  ;;  %v996_v12 = vand.u32 4294901760, %v45_v43  ;;  %v174_v59 = vand.u32 4294901760, %v173_v32  ;;  %v1069_v23 = vand.u32 4294901760, %v40_v2 }
  0x19   :  { %222 = vmatpush.msra.mxu2 %v890_v52  ;;  %268 = vmatpush.msra.mxu3 %v871_v44  ;;  %v1395_v14 = vand.u32 4294901760, %v1044_v62 }
  0x1a   :  { %74 = vmatpush.msra.mxu0 %v886_v50  ;;  %139 = vmatpush.msra.mxu1 %v138_v36  ;;  %v156_v36 = vand.u32 4294901760, %v155_v48  ;;  %v162_v48 = vand.u32 4294901760, %v161_v61  ;;  %v1026_v57 = vsub.f32 %v45_v43, %v996_v12  ;;  %v179_v43 = vsub.f32 %v976_v49, %v1387_v37 }
  0x1b   :  { %225 = vmatpush.msra.mxu2 %v905_v58  ;;  %270 = vmatpush.msra.mxu3 %v886_v50  ;;  %v1393_v61 = vand.u32 4294901760, %v1010_v38  ;;  %v185_v37 = vsub.f32 %v983_v55, %v1392_v41 }
  0x1c   :  { %76 = vmatpush.msra.mxu0 %v894_v53  ;;  %145 = vmatpush.msra.mxu1 %v144_v47  ;;  %v42_v47 = vld [vmem:[%s1372_s1 + $0xc8] sm:$0xff]  ;;  %v1394_v27 = vand.u32 4294901760, %v1026_v57  ;;  %v180_v32 = vand.u32 4294901760, %v179_v43 }
  0x1d   :  { %228 = vmatpush.msra.mxu2 %v923_v1  ;;  %272 = vmatpush.msra.mxu3 %v894_v53  ;;  %v1046_v28 = vand.u32 4294901760, %v42_v47  ;;  %v448_v13 = vsub.f32 %v1010_v38, %v1393_v61  ;;  %v38_v43 = vld [vmem:[%s1372_s1 + $0xa8] sm:$0xff]  ;;  %v186_v61 = vand.u32 4294901760, %v185_v37 }
  0x1e   :  { %78 = vmatpush.msra.mxu0 %v919_v63  ;;  %151 = vmatpush.msra.mxu1 %v150_v60  ;;  %v436_v60 = vsub.f32 %v966_v42, %v1386_v6  ;;  %v1056_v6 = vand.u32 4294901760, %v41_v45 }
  0x1f   :  { %231 = vmatpush.msra.mxu2 %v934_v7  ;;  %274 = vmatpush.msra.mxu3 %v919_v63  ;;  %v449_v37 = vand.u32 4294901760, %v448_v13 }
  0x20   :  { %80 = vmatpush.msra.mxu0 %v942_v21  ;;  %157 = vmatpush.msra.mxu1 %v156_v36  ;;  %v442_v36 = vsub.f32 %v986_v56, %v1390_v0  ;;  %v437_v0 = vand.u32 4294901760, %v436_v60  ;;  %v1396_v60 = vand.u32 4294901760, %v799_v15 }
  0x21   :  { %234 = vmatpush.msra.mxu2 %v960_v39  ;;  %276 = vmatpush.msra.mxu3 %v942_v21 }
  0x22   :  { %82 = vmatpush.msra.mxu0 %v947_v30  ;;  %163 = vmatpush.msra.mxu1 %v162_v48  ;;  %v39_v48 = vld [vmem:[%s1372_s1 + $0xb0] sm:$0xff]  ;;  %v443_v41 = vand.u32 4294901760, %v442_v36  ;;  %v1397_v36 = vand.u32 4294901760, %v803_v16  ;;  %v1111_v16 = vand.u32 4294901760, %v38_v43 }
  0x23   :  { %237 = vmatpush.msra.mxu2 %v976_v49  ;;  %278 = vmatpush.msra.mxu3 %v947_v30 }
  0x24   :  { %289 = vmatpush.msrb.mxu0 %v94_v22  ;;  %169 = vmatpush.msra.mxu1 %v168_v35  ;;  %v1080_v22 = vsub.f32 %v42_v47, %v1046_v28  ;;  %v1086_v35 = vsub.f32 %v41_v45, %v1056_v6  ;;  %v454_v47 = vsub.f32 %v1026_v57, %v1394_v27 }
  0x25   :  { %240 = vmatpush.msra.mxu2 %v983_v55  ;;  %438 = vmatpush.msrb.mxu3 %v437_v0  ;;  %v1101_v45 = vsub.f32 %v40_v2, %v1069_v23  ;;  %v460_v27 = vsub.f32 %v1044_v62, %v1395_v14  ;;  %v1398_v0 = vand.u32 4294901760, %v808_v18  ;;  %v1140_v2 = vsub.f32 %v38_v43, %v1111_v16 }
  0x26   :  { %293 = vmatpush.msrb.mxu0 %v1396_v60  ;;  %175 = vmatpush.msra.mxu1 %v174_v59  ;;  %v1096_v60 = vand.u32 4294901760, %v39_v48  ;;  %v37_v59 = vld [vmem:[%s1372_s1 + $0xa0] sm:$0xff]  ;;  %v455_v13 = vand.u32 4294901760, %v454_v47 }
  0x27   :  { %393 = vmatpush.msrb.mxu2 %v936_v8  ;;  %444 = vmatpush.msrb.mxu3 %v443_v41  ;;  %v1126_v18 = vand.u32 4294901760, %v37_v59  ;;  %v1400_v41 = vand.u32 4294901760, %v811_v19  ;;  %v461_v47 = vand.u32 4294901760, %v460_v27  ;;  %v35_v27 = vld [vmem:[%s1372_s1 + $0x90] sm:$0xff] }
  0x28   :  { %297 = vmatpush.msrb.mxu0 %v1397_v36  ;;  %181 = vmatpush.msra.mxu1 %v180_v32  ;;  %v36_v32 = vld [vmem:[%s1372_s1 + $0x98] sm:$0xff]  ;;  %v1399_v36 = vand.u32 4294901760, %v1064_v24  ;;  %v1124_v15 = vsub.f32 %v39_v48, %v1096_v60  ;;  %v1401_v48 = vand.u32 4294901760, %v1080_v22 }
  0x29   :  { %395 = vmatpush.msrb.mxu2 %v949_v31  ;;  %450 = vmatpush.msrb.mxu3 %v449_v37  ;;  %v1142_v19 = vand.u32 4294901760, %v36_v32  ;;  %v1171_v37 = vand.u32 4294901760, %v35_v27 }
  0x2a   :  { %301 = vmatpush.msrb.mxu0 %v1398_v0  ;;  %187 = vmatpush.msra.mxu1 %v186_v61  ;;  %v466_v14 = vsub.f32 %v1064_v24, %v1399_v36  ;;  %v15_v61 = vld [vmem:[%s1373_s2] sm:$0xff]  ;;  %v472_v36 = vsub.f32 %v1080_v22, %v1401_v48  ;;  %v1156_v48 = vsub.f32 %v37_v59, %v1126_v18 }
  0x2b   :  { %397 = vmatpush.msrb.mxu2 %v978_v54  ;;  %456 = vmatpush.msrb.mxu3 %v455_v13 }
  0x2c   :  { %305 = vmatpush.msrb.mxu0 %v1400_v41  ;;  %356 = vmatpush.msrb.mxu1 %v767_v3  ;;  %v1402_v3 = vand.u32 4294901760, %v814_v20  ;;  %v1403_v41 = vand.u32 4294901760, %v1086_v35  ;;  %v467_v43 = vand.u32 4294901760, %v466_v14  ;;  %v1158_v20 = vand.u32 4294901760, %v15_v61  ;;  %v34_v14 = vld [vmem:[%s1372_s1 + $0x88] sm:$0xff] }
  0x2d   :  { %399 = vmatpush.msrb.mxu2 %v996_v12  ;;  %462 = vmatpush.msrb.mxu3 %v461_v47  ;;  %v473_v59 = vand.u32 4294901760, %v472_v36  ;;  %v1407_v47 = vand.u32 4294901760, %v1124_v15 }
  0x2e   :  { %309 = vmatpush.msrb.mxu0 %v1402_v3  ;;  %358 = vmatpush.msrb.mxu1 %v769_v4  ;;  %v478_v0 = vsub.f32 %v1086_v35, %v1403_v41  ;;  %v1404_v4 = vand.u32 4294901760, %v833_v29  ;;  %v1405_v3 = vand.u32 4294901760, %v1101_v45  ;;  %v1174_v29 = vsub.f32 %v36_v32, %v1142_v19 }
  0x2f   :  { %401 = vmatpush.msrb.mxu2 %v1012_v26  ;;  %468 = vmatpush.msrb.mxu3 %v467_v43  ;;  %v490_v36 = vsub.f32 %v1124_v15, %v1407_v47  ;;  %v1188_v13 = vsub.f32 %v15_v61, %v1158_v20  ;;  %v1409_v43 = vand.u32 4294901760, %v1140_v2  ;;  %v1201_v61 = vsub.f32 %v35_v27, %v1171_v37 }
  0x30   :  { %313 = vmatpush.msrb.mxu0 %v1404_v4  ;;  %360 = vmatpush.msrb.mxu1 %v771_v5  ;;  %v484_v41 = vsub.f32 %v1101_v45, %v1405_v3  ;;  %v1406_v5 = vand.u32 4294901760, %v861_v40  ;;  %v479_v4 = vand.u32 4294901760, %v478_v0  ;;  %v33_v3 = vld [vmem:[%s1372_s1 + $0x80] sm:$0xff]  ;;  %v1190_v40 = vand.u32 4294901760, %v34_v14 }
  0x31   :  { %403 = vmatpush.msrb.mxu2 %v1028_v51  ;;  %474 = vmatpush.msrb.mxu3 %v473_v59  ;;  %v507_v47 = vand.u32 4294901760, %v1174_v29  ;;  %v1203_v32 = vand.u32 4294901760, %v33_v3 }
  0x32   :  { %317 = vmatpush.msrb.mxu0 %v1406_v5  ;;  %362 = vmatpush.msrb.mxu1 %v782_v9  ;;  %v1408_v9 = vand.u32 4294901760, %v875_v46  ;;  %v485_v0 = vand.u32 4294901760, %v484_v41  ;;  %v496_v5 = vsub.f32 %v1140_v2, %v1409_v43  ;;  %v1410_v46 = vand.u32 4294901760, %v890_v52 }
  0x33   :  { %405 = vmatpush.msrb.mxu2 %v1046_v28  ;;  %480 = vmatpush.msrb.mxu3 %v479_v4  ;;  %v1411_v41 = vand.u32 4294901760, %v1156_v48  ;;  %v1214_v27 = vsub.f32 %v34_v14, %v1190_v40  ;;  %v1412_v43 = vand.u32 4294901760, %v905_v58  ;;  %v508_v52 = vsub.f32 %v1174_v29, %v507_v47 }
  0x34   :  { %321 = vmatpush.msrb.mxu0 %v1408_v9  ;;  %364 = vmatpush.msrb.mxu1 %v784_v10  ;;  %v491_v10 = vand.u32 4294901760, %v490_v36  ;;  %v85_v9 = vand.u32 4294901760, %v1188_v13  ;;  %v513_v4 = vand.u32 4294901760, %v1201_v61  ;;  %v1225_v36 = vsub.f32 %v33_v3, %v1203_v32 }
  0x35   :  { %407 = vmatpush.msrb.mxu2 %v1056_v6  ;;  %v502_v59 = vsub.f32 %v1156_v48, %v1411_v41  ;;  %486 = vmatpush.msrb.mxu3 %v485_v0  ;;  %v1413_v14 = vand.u32 4294901760, %v923_v1  ;;  %v1414_v3 = vand.u32 4294901760, %v934_v7  ;;  %v1415_v41 = vand.u32 4294901760, %v960_v39 }
  0x36   :  { %325 = vmatpush.msrb.mxu0 %v1410_v46  ;;  %366 = vmatpush.msrb.mxu1 %v786_v11  ;;  %v497_v11 = vand.u32 4294901760, %v496_v5  ;;  %v86_v0 = vsub.f32 %v1188_v13, %v85_v9  ;;  %v519_v5 = vand.u32 4294901760, %v1214_v27  ;;  %v514_v46 = vsub.f32 %v1201_v61, %v513_v4 }
  0x37   :  { %409 = vmatpush.msrb.mxu2 %v1069_v23  ;;  %492 = vmatpush.msrb.mxu3 %v491_v10  ;;  %v503_v58 = vand.u32 4294901760, %v502_v59  ;;  %v525_v10 = vand.u32 4294901760, %v1225_v36  ;;  %v1416_v59 = vand.u32 4294901760, %v976_v49 }
  0x38   :  { %329 = vmatpush.msrb.mxu0 %v1412_v43  ;;  %368 = vmatpush.msrb.mxu1 %v805_v17  ;;  %v16_v17 = vld [vmem:[%s1373_s2 + $0x8] sm:$0xff]  ;;  %v520_v7 = vsub.f32 %v1214_v27, %v519_v5  ;;  %v515_v39 = vand.u32 4294901760, %v514_v46 }
  0x39   :  { %411 = vmatpush.msrb.mxu2 %v1096_v60  ;;  %498 = vmatpush.msrb.mxu3 %v497_v11  ;;  %v1240_v1 = vand.u32 4294901760, %v16_v17  ;;  %v1417_v11 = vand.u32 4294901760, %v983_v55  ;;  %v1421_v55 = vand.u32 4294901760, %v1026_v57 }
  0x3a   :  { %333 = vmatpush.msrb.mxu0 %v1413_v14  ;;  %370 = vmatpush.msrb.mxu1 %v824_v25  ;;  %v509_v25 = vand.u32 4294901760, %v508_v52 }
  0x3b   :  { %413 = vmatpush.msrb.mxu2 %v1111_v16  ;;  %504 = vmatpush.msrb.mxu3 %v503_v58  ;;  %v1261_v43 = vsub.f32 %v16_v17, %v1240_v1 }
  0x3c   :  { %337 = vmatpush.msrb.mxu0 %v1414_v3  ;;  %372 = vmatpush.msrb.mxu1 %v846_v33  ;;  %v87_v33 = vand.u32 4294901760, %v86_v0 }
  0x3d   :  { %415 = vmatpush.msrb.mxu2 %v1126_v18  ;;  %510 = vmatpush.msrb.mxu3 %v509_v25  ;;  %v426_v52 = vand.u32 4294901760, %v1261_v43 }
  0x3e   :  { %341 = vmatpush.msrb.mxu0 %v1415_v41  ;;  %374 = vmatpush.msrb.mxu1 %v849_v34  ;;  %v526_v34 = vsub.f32 %v1225_v36, %v525_v10 }
  0x3f   :  { %417 = vmatpush.msrb.mxu2 %v1142_v19  ;;  %88 = vmatmul.f32.vlgmr.msra.gmra.mxu0 %v87_v33 }
  0x40   :  { %345 = vmatpush.msrb.mxu0 %v1416_v59  ;;  %376 = vmatpush.msrb.mxu1 %v871_v44  ;;  %v521_v44 = vand.u32 4294901760, %v520_v7  ;;  %v527_v49 = vand.u32 4294901760, %v526_v34 }
  0x41   :  { %419 = vmatpush.msrb.mxu2 %v1171_v37  ;;  %516 = vmatpush.msrb.mxu3 %v515_v39 }
  0x42   :  { %349 = vmatpush.msrb.mxu0 %v1417_v11  ;;  %378 = vmatpush.msrb.mxu1 %v886_v50  ;;  %v1418_v50 = vand.u32 4294901760, %v966_v42 }
  0x43   :  { %421 = vmatpush.msrb.mxu2 %v1190_v40  ;;  %522 = vmatpush.msrb.mxu3 %v521_v44 }
  0x44   :  { %536 = vmatpush.msra.mxu0 %v966_v42  ;;  %380 = vmatpush.msrb.mxu1 %v894_v53  ;;  %v427_v53 = vsub.f32 %v1261_v43, %v426_v52 }
  0x45   :  { %423 = vmatpush.msrb.mxu2 %v1203_v32  ;;  %528 = vmatpush.msrb.mxu3 %v527_v49 }
  0x46   :  { %539 = vmatpush.msra.mxu0 %v986_v56  ;;  %382 = vmatpush.msrb.mxu1 %v919_v63  ;;  %v1419_v63 = vand.u32 4294901760, %v986_v56  ;;  %v428_v42 = vand.u32 4294901760, %v427_v53 }
  0x47   :  { %243 = vmatmul.f32.vlgmr.msra.gmra.mxu2 %v1188_v13  ;;  %282 = vmatmul.f32.vlgmr.msra.gmra.mxu3 %v85_v9 }
  0x48   :  { %542 = vmatpush.msra.mxu0 %v1010_v38  ;;  %630 = vmatpush.msra.mxu2 %v1418_v50 }
  0x49   :  { %384 = vmatpush.msrb.mxu1 %v942_v21  ;;  %697 = vmatpush.msra.mxu3 %v936_v8  ;;  %v1420_v21 = vand.u32 4294901760, %v1010_v38 }
  0x4a   :  { %545 = vmatpush.msra.mxu0 %v1026_v57  ;;  %634 = vmatpush.msra.mxu2 %v1419_v63  ;;  %v1423_v57 = vand.u32 4294901760, %v1064_v24 }
  0x4b   :  { %386 = vmatpush.msrb.mxu1 %v947_v30  ;;  %699 = vmatpush.msra.mxu3 %v949_v31  ;;  %v1422_v30 = vand.u32 4294901760, %v1044_v62 }
  0x4c   :  { %548 = vmatpush.msra.mxu0 %v1044_v62  ;;  %189 = vmatmul.f32.vlgmr.msra.gmra.mxu1 %v1158_v20 }
  0x4d   :  { %638 = vmatpush.msra.mxu2 %v1420_v21  ;;  %589 = vmatpush.msra.mxu1 %v936_v8  ;;  %v1424_v8 = vand.u32 4294901760, %v1080_v22 }
  0x4e   :  { %551 = vmatpush.msra.mxu0 %v1064_v24  ;;  %701 = vmatpush.msra.mxu3 %v978_v54  ;;  %v1425_v24 = vand.u32 4294901760, %v1086_v35 }
  0x4f   :  { %642 = vmatpush.msra.mxu2 %v1421_v55  ;;  %591 = vmatpush.msra.mxu1 %v949_v31  ;;  %v1429_v31 = vand.u32 4294901760, %v1156_v48 }
  0x50   :  { %429 = vmatmul.f32.vlgmr.msrb.gmra.mxu2 %v428_v42  ;;  %554 = vmatpush.msra.mxu0 %v1080_v22 }
  0x51   :  { %593 = vmatpush.msra.mxu1 %v978_v54  ;;  %646 = vmatpush.msra.mxu2 %v1422_v30 }
  0x52   :  { %703 = vmatpush.msra.mxu3 %v996_v12  ;;  %351 = vmatmul.f32.vlgmr.msrb.gmra.mxu0 %v1158_v20 }
  0x53   :  { %530 = vmatmul.f32.vlgmr.msrb.gmra.mxu3 %v1240_v1  ;;  %557 = vmatpush.msra.mxu0 %v1086_v35 }
  0x54   :  { %595 = vmatpush.msra.mxu1 %v996_v12  ;;  %650 = vmatpush.msra.mxu2 %v1423_v57 }
  0x55   :  { %705 = vmatpush.msra.mxu3 %v1012_v26  ;;  %388 = vmatmul.f32.vlgmr.msrb.gmra.mxu1 %v1158_v20 }
  0x56   :  { %560 = vmatpush.msra.mxu0 %v1101_v45  ;;  %597 = vmatpush.msra.mxu1 %v1012_v26  ;;  %v1426_v26 = vand.u32 4294901760, %v1101_v45 }
  0x57   :  { %654 = vmatpush.msra.mxu2 %v1424_v8  ;;  %707 = vmatpush.msra.mxu3 %v1028_v51 }
  0x58   :  { %563 = vmatpush.msra.mxu0 %v1124_v15  ;;  %599 = vmatpush.msra.mxu1 %v1028_v51  ;;  %v1427_v51 = vand.u32 4294901760, %v1124_v15 }
  0x59   :  { %658 = vmatpush.msra.mxu2 %v1425_v24  ;;  %709 = vmatpush.msra.mxu3 %v1046_v28 }
  0x5a   :  { %566 = vmatpush.msra.mxu0 %v1140_v2  ;;  %601 = vmatpush.msra.mxu1 %v1046_v28  ;;  %v1428_v28 = vand.u32 4294901760, %v1140_v2 }
  0x5b   :  { %662 = vmatpush.msra.mxu2 %v1426_v26  ;;  %711 = vmatpush.msra.mxu3 %v1056_v6 }
  0x5c   :  { %569 = vmatpush.msra.mxu0 %v1156_v48  ;;  %603 = vmatpush.msra.mxu1 %v1056_v6 }
  0x5d   :  { %666 = vmatpush.msra.mxu2 %v1427_v51  ;;  %713 = vmatpush.msra.mxu3 %v1069_v23 }
  0x5e   :  { %572 = vmatpush.msra.mxu0 %v1174_v29  ;;  %605 = vmatpush.msra.mxu1 %v1069_v23  ;;  %v50_v23 = vstv %s1374_s0 }
  0x5f   :  { %670 = vmatpush.msra.mxu2 %v1428_v28  ;;  %715 = vmatpush.msra.mxu3 %v1096_v60 }
  0x60   :  { %575 = vmatpush.msra.mxu0 %v1201_v61  ;;  %607 = vmatpush.msra.mxu1 %v1096_v60 }
  0x61   :  { %674 = vmatpush.msra.mxu2 %v1429_v31  ;;  %717 = vmatpush.msra.mxu3 %v1111_v16 }
  0x62   :  { %578 = vmatpush.msra.mxu0 %v1214_v27  ;;  %609 = vmatpush.msra.mxu1 %v1111_v16 }
  0x63   :  { %678 = vmatpush.msra.mxu2 %v507_v47  ;;  %719 = vmatpush.msra.mxu3 %v1126_v18 }
  0x64   :  { %581 = vmatpush.msra.mxu0 %v1225_v36  ;;  %611 = vmatpush.msra.mxu1 %v1126_v18 }
  0x65   :  { %682 = vmatpush.msra.mxu2 %v513_v4  ;;  %721 = vmatpush.msra.mxu3 %v1142_v19 }
  0x66   :  { %584 = vmatmul.f32.vlgmr.msra.gmra.mxu0 %v1261_v43  ;;  %613 = vmatpush.msra.mxu1 %v1142_v19 }
  0x67   :  { %686 = vmatpush.msra.mxu2 %v519_v5  ;;  %723 = vmatpush.msra.mxu3 %v1171_v37 }
  0x68   :  { %615 = vmatpush.msra.mxu1 %v1171_v37 }
  0x69   :  { %690 = vmatpush.msra.mxu2 %v525_v10  ;;  %725 = vmatpush.msra.mxu3 %v1190_v40 }
  0x6a   :  { %692 = vmatmul.f32.vlgmr.msra.gmra.mxu2 %v1240_v1  ;;  %617 = vmatpush.msra.mxu1 %v1190_v40 }
  0x6b   :  { %727 = vmatpush.msra.mxu3 %v1203_v32 }
  0x6c   :  { %729 = vmatmul.f32.vlgmr.msra.gmra.mxu3 %v1240_v1  ;;  %619 = vmatpush.msra.mxu1 %v1203_v32 }
  0x6d   :  { %623 = vmatmul.f32.vlgmr.msra.gmra.mxu1 %v426_v52 }
  0xbc   :  { %v89_v38 = vpop.f32.mrf.mxu0 }
  0xbd   :  { %v90_v54 = vadd.f32 %v89_v38, %v50_v23 }
  0xc9   :  { %v190_v56 = vpop.f32.mrf.mxu1 }
  0xca   :  { %v191_v62 = vadd.f32 %v190_v56, %v90_v54  ;;  %v244_v12 = vpop.f32.mrf.mxu2  ;;  %v283_v22 = vpop.f32.mrf.mxu3 }
  0xcc   :  { %v245_v6 = vadd.f32 %v244_v12, %v191_v62 }
  0xce   :  { %v284_v35 = vadd.f32 %v283_v22, %v245_v6 }
  0xcf   :  { %v352_v15 = vpop.f32.mrf.mxu0 }
  0xd0   :  { %v353_v60 = vadd.f32 %v352_v15, %v284_v35 }
  0xd2   :  { %v389_v45 = vpop.f32.mrf.mxu1 }
  0xd3   :  { %v390_v16 = vadd.f32 %v389_v45, %v353_v60  ;;  %v430_v2 = vpop.f32.mrf.mxu2 }
  0xd5   :  { %v431_v18 = vadd.f32 %v430_v2, %v390_v16 }
  0xd6   :  { %v531_v19 = vpop.f32.mrf.mxu3 }
  0xd7   :  { %v532_v48 = vadd.f32 %v531_v19, %v431_v18 }
  0xe3   :  { %v585_v37 = vpop.f32.mrf.mxu0 }
  0xe4   :  { %v586_v20 = vadd.f32 %v585_v37, %v532_v48 }
  0xea   :  { %v624_v13 = vpop.f32.mrf.mxu1 }
  0xeb   :  { %v625_v29 = vadd.f32 %v624_v13, %v586_v20 }
  0xed   :  { %v693_v32 = vpop.f32.mrf.mxu2 }
  0xee   :  { %v694_v40 = vadd.f32 %v693_v32, %v625_v29 }
  0xef   :  { %v730_v47 = vpop.f32.mrf.mxu3 }
  0xf0   :  { %v731_v61 = vadd.f32 %v730_v47, %v694_v40 }
  0xf2   :  { %733 = vst [vmem:[%s1375_s3] sm:$0xff] %v731_v61 }

</bundles_post_ra>
